<compile_context>
chip_gen: v7x
topology: tpu7x:2x2x1
jax: 0.10.0
libtpu: 0.0.40
codegen_flags: <defaults>
</compile_context>

<pallas_src>
import jax
import jax.numpy as jnp
from jax import lax
from jax.experimental import pallas as pl
from jax.experimental.pallas import tpu as pltpu

# ----------------------------- small config ---------------------------------
B = 2              # batch
C_FEAT = 8         # backbone feature-map channels   (stand-in for 1024)
FH = FW = 4        # backbone feature-map spatial    (stand-in for 14x14)
DIM = 32           # token / embedding dim           (stand-in for 1024)
HEADS = 4
HEAD_DIM = DIM // HEADS
MLP_HIDDEN = 64
DEPTH = 2
NUM_CLASSES = 10
N_PATCH = FH * FW
N_TOK = N_PATCH + 1
N_CLS_PAD = 128    # classifier output padded to a full 128-lane slab (10 -> 128)
EPS = 1e-6


def _round_up(x, m):
    return ((x + m - 1) // m) * m


# Token padding: at toy dims just round to a sublane multiple (avoid 7.5x redundant
# work); at real dims (197 tokens) this rounds up to 256, matching the 256-wide MXU.
N_PAD = _round_up(N_TOK, 8) if N_TOK <= 64 else _round_up(N_TOK, 128)

# lane width of the packed per-depth small-parameter tensor
SMALL_LANES = max(3 * DIM, MLP_HIDDEN, DIM)


def _vmem_limit_bytes():
    # Generation-safe VMEM budget: ~85% of the per-TC capacity
    # (≈54 MiB on v7x's 64 MiB, ≈108 MiB on v5e/v6e's 128 MiB).
    try:
        cap = pltpu.get_tpu_info().vmem_capacity_bytes
    except Exception:
        cap = 64 * 1024 * 1024
    return int(cap * 0.85)


VMEM_LIMIT = _vmem_limit_bytes()

# Deeper weight-stream buffering only pays off on the 128 MiB parts (v5e/v6e) and
# only when the depth axis is long enough; otherwise keep default double-buffering.
WEIGHT_BUFFERS = 3 if (VMEM_LIMIT >= 90 * 1024 * 1024 and DEPTH >= 3) else 2


def _pick_chunk(batch):
    # Keep >= 2 chunks on the parallel grid axis (v7x has 2 TensorCores per chip)
    # while packing as many samples per chunk as possible so each per-depth weight
    # DMA is amortized over CHUNK samples.
    if batch <= 1:
        return 1
    for nchunks in (2, 4, 8, batch):
        if batch % nchunks == 0:
            return batch // nchunks
    return 1


CHUNK = _pick_chunk(B)


# ----------------------------- helpers ---------------------------------------
def _layernorm_f32(x, gamma, beta):
    x = x.astype(jnp.float32)
    mu = jnp.mean(x, axis=-1, keepdims=True)
    var = jnp.mean(jnp.square(x - mu), axis=-1, keepdims=True)
    return (x - mu) * lax.rsqrt(var + EPS) * gamma + beta


# --------------------------- patch-embed kernel ------------------------------
def _patch_embed_kernel(x_ref, w_ref, b_ref, o_ref):
    # (TM, K)bf16 @ (K, N)bf16 + (1, N)f32 ; f32 accumulation, bf16 store
    o_ref[...] = (jnp.dot(x_ref[...], w_ref[...],
                          preferred_element_type=jnp.float32)
                  + b_ref[...]).astype(o_ref.dtype)


def patch_embed(tokens_bf16, w_bf16, b_f32):
    M, K = tokens_bf16.shape
    N = w_bf16.shape[1]
    TM = 128
    m_pad = _round_up(M, TM)                       # keep the M-tiled grid at any M
    x = jnp.pad(tokens_bf16, ((0, m_pad - M), (0, 0)))
    out = pl.pallas_call(
        _patch_embed_kernel,
        out_shape=jax.ShapeDtypeStruct((m_pad, N), jnp.bfloat16),
        grid=(m_pad // TM,),
        in_specs=[pl.BlockSpec((TM, K), lambda i: (i, 0)),
                  pl.BlockSpec((K, N), lambda i: (0, 0)),
                  pl.BlockSpec((1, N), lambda i: (0, 0))],
        out_specs=pl.BlockSpec((TM, N), lambda i: (i, 0)),
        compiler_params=pltpu.CompilerParams(
            dimension_semantics=("parallel",),
            vmem_limit_bytes=VMEM_LIMIT),
    )(x, w_bf16, b_f32.reshape(1, N))
    return out[:M]


# ------------------ fused transformer (depth) + LN + FC head -----------------
def _vtr_kernel(x_ref, small_ref, wqkv_ref, wo_ref, w1_ref, w2_ref,
                kbias_ref, norm_gb_ref, fcw_ref, fcb_ref,
                logits_ref, xs_ref):
    d = pl.program_id(1)          # depth index (inner, "arbitrary" axis)

    @pl.when(d == 0)
    def _():
        # bf16 HBM input -> resident f32 activation scratch for the whole chunk
        xs_ref[...] = x_ref[...].astype(jnp.float32)

    # -------- unpack the single packed per-depth small-parameter block --------
    sm = small_ref[0]                               # (8, SMALL_LANES) f32
    ln1_g = sm[0:1, 0:DIM]
    ln1_b = sm[1:2, 0:DIM]
    bqkv = sm[2:3, 0:3 * DIM]
    bo = sm[3:4, 0:DIM]
    ln2_g = sm[4:5, 0:DIM]
    ln2_b = sm[5:6, 0:DIM]
    b1 = sm[6:7, 0:MLP_HIDDEN]
    b2 = sm[7:8, 0:DIM]

    wqkv = wqkv_ref[0]                              # (DIM, 3*DIM) bf16
    wo = wo_ref[0]                                  # (DIM, DIM)   bf16
    w1 = w1_ref[0]                                  # (DIM, MLP)   bf16
    w2 = w2_ref[0]                                  # (MLP, DIM)   bf16
    key_bias = kbias_ref[...]                       # (1, N_PAD) f32, hoisted constant

    scale = 1.0 / (HEAD_DIM ** 0.5)
    dn_qkT = (((1,), (1,)), ((), ()))               # contract last dims: q @ k^T

    # Static unroll over the chunk: every per-depth weight fetch above is reused
    # CHUNK times (at real batch sizes use a fori_loop(..., unroll=True) instead).
    for s in range(CHUNK):
        x = xs_ref[s]                               # (N_PAD, DIM) f32, VMEM-resident

        # ---------------- MHSA (pre-norm) ----------------
        h = _layernorm_f32(x, ln1_g, ln1_b)
        qkv = jnp.dot(h.astype(jnp.bfloat16), wqkv,
                      preferred_element_type=jnp.float32) + bqkv   # (N, 3D) f32

        ctx_heads = []
        for hd in range(HEADS):                     # lane slices: no (N,H,Hd) swapaxes
            lo = hd * HEAD_DIM
            qh = (qkv[:, lo:lo + HEAD_DIM] * scale).astype(jnp.bfloat16)
            kh = qkv[:, DIM + lo:DIM + lo + HEAD_DIM].astype(jnp.bfloat16)
            vh = qkv[:, 2 * DIM + lo:2 * DIM + lo + HEAD_DIM].astype(jnp.bfloat16)
            sc = lax.dot_general(qh, kh, dn_qkT,
                                 preferred_element_type=jnp.float32) + key_bias
            sc = sc - jnp.max(sc, axis=-1, keepdims=True)
            p = jnp.exp(sc)
            p = p * pl.reciprocal(jnp.sum(p, axis=-1, keepdims=True), approx=True)
            ctx_heads.append(jnp.dot(p.astype(jnp.bfloat16), vh,
                                     preferred_element_type=jnp.float32))
        ctx = jnp.concatenate(ctx_heads, axis=-1)                  # (N, DIM) f32
        attn = jnp.dot(ctx.astype(jnp.bfloat16), wo,
                       preferred_element_type=jnp.float32) + bo
        x = x + attn                                               # residual

        # ---------------- MLP (pre-norm) ----------------
        h = _layernorm_f32(x, ln2_g, ln2_b)
        h = jnp.dot(h.astype(jnp.bfloat16), w1,
                    preferred_element_type=jnp.float32) + b1
        # TODO(synk): torch nn.GELU default is exact erf; tanh approximation used here.
        h = jax.nn.gelu(h, approximate=True)
        h = jnp.dot(h.astype(jnp.bfloat16), w2,
                    preferred_element_type=jnp.float32) + b2
        x = x + h                                                  # residual

        xs_ref[s] = x

    # ------- final LayerNorm on cls token + FC head (fused at last depth) -----
    @pl.when(d == pl.num_programs(1) - 1)
    def _():
        norm_g = norm_gb_ref[0:1, :]
        norm_b = norm_gb_ref[1:2, :]
        for s in range(CHUNK):
            cls = xs_ref[s, 0:1, :]                                # (1, DIM)
            hn = _layernorm_f32(cls, norm_g, norm_b)
            logits = jnp.dot(hn.astype(jnp.bfloat16), fcw_ref[...],
                             preferred_element_type=jnp.float32) + fcb_ref[...]
            logits_ref[s] = logits.astype(logits_ref.dtype)        # (1, N_CLS_PAD)


def transformer_forward(x_pad_bf16, p):
    Bq = x_pad_bf16.shape[0]
    assert Bq % CHUNK == 0
    n_chunks = Bq // CHUNK
    depth = p["wqkv"].shape[0]

    def wspec(shape):             # per-depth stacked weights: block indexed by d
        blk = (1,) + tuple(shape[1:])
        imap = lambda c, d, _n=len(shape): (d,) + (0,) * (_n - 1)
        if WEIGHT_BUFFERS > 2:    # deeper weight buffering on the 128 MiB parts
            return pl.BlockSpec(blk, imap, pipeline_mode=pl.Buffered(WEIGHT_BUFFERS))
        return pl.BlockSpec(blk, imap)

    def cspec(shape):             # shared (head/mask) params: constant full block
        return pl.BlockSpec(tuple(shape), lambda c, d, _n=len(shape): (0,) * _n)

    return pl.pallas_call(
        _vtr_kernel,
        out_shape=jax.ShapeDtypeStruct((Bq, 1, N_CLS_PAD), jnp.float32),
        grid=(n_chunks, depth),
        in_specs=[
            pl.BlockSpec((CHUNK, N_PAD, DIM), lambda c, d: (c, 0, 0)),
            wspec(p["small"].shape),
            wspec(p["wqkv"].shape),
            wspec(p["wo"].shape),
            wspec(p["w1"].shape),
            wspec(p["w2"].shape),
            cspec(p["key_bias"].shape),
            cspec(p["norm_gb"].shape),
            cspec(p["fc_w"].shape),
            cspec(p["fc_b"].shape),
        ],
        out_specs=pl.BlockSpec((CHUNK, 1, N_CLS_PAD), lambda c, d: (c, 0, 0)),
        scratch_shapes=[pltpu.VMEM((CHUNK, N_PAD, DIM), jnp.float32)],
        compiler_params=pltpu.CompilerParams(
            dimension_semantics=("parallel", "arbitrary"),
            vmem_limit_bytes=VMEM_LIMIT),
    )(x_pad_bf16, p["small"], p["wqkv"], p["wo"], p["w1"], p["w2"],
      p["key_bias"], p["norm_gb"], p["fc_w"], p["fc_b"])


# ------------------------------ parameters ----------------------------------
def init_params(key):
    ks = jax.random.split(key, 8)

    def nrm(k, shape, std=0.02):
        return std * jax.random.normal(k, shape, dtype=jnp.float32)

    # packed per-depth small params (one DMA per depth step):
    # rows: [ln1_g, ln1_b, bqkv, bo, ln2_g, ln2_b, b1, b2]
    small = jnp.zeros((DEPTH, 8, SMALL_LANES), jnp.float32)
    small = small.at[:, 0, :DIM].set(1.0)   # ln1 gamma
    small = small.at[:, 4, :DIM].set(1.0)   # ln2 gamma
    # (all biases / LN betas are zero-initialized)

    # key-padding bias, hoisted out of the kernel body (constant input)
    key_bias = jnp.where(jnp.arange(N_PAD) < N_TOK, 0.0, -1e30)
    key_bias = key_bias.astype(jnp.float32).reshape(1, N_PAD)

    return {
        # patch_embed: nn.Conv2d(feature_dim, dim, 1) == (C_feat, DIM) matmul
        "pe_w": nrm(ks[0], (C_FEAT, DIM)).astype(jnp.bfloat16),
        "pe_b": jnp.zeros((DIM,), jnp.float32),
        "cls": nrm(ks[1], (1, 1, DIM)),
        "pos": nrm(ks[2], (1, N_TOK, DIM)),
        # per-block params stacked on a leading depth axis (streamed per depth step)
        "small": small,
        "wqkv": nrm(ks[3], (DEPTH, DIM, 3 * DIM)).astype(jnp.bfloat16),
        "wo": nrm(ks[4], (DEPTH, DIM, DIM)).astype(jnp.bfloat16),
        "w1": nrm(ks[5], (DEPTH, DIM, MLP_HIDDEN)).astype(jnp.bfloat16),
        "w2": nrm(ks[6], (DEPTH, MLP_HIDDEN, DIM)).astype(jnp.bfloat16),
        # shared
        "key_bias": key_bias,
        "norm_gb": jnp.stack([jnp.ones((DIM,), jnp.float32),
                              jnp.zeros((DIM,), jnp.float32)], axis=0),   # (2, DIM)
        "fc_w": jnp.pad(nrm(ks[7], (DIM, NUM_CLASSES)),
                        ((0, 0), (0, N_CLS_PAD - NUM_CLASSES))).astype(jnp.bfloat16),
        "fc_b": jnp.zeros((1, N_CLS_PAD), jnp.float32),
    }


# ------------------------------ forward pass --------------------------------
def vtr_forward(feat, params):
    """feat: backbone feature map, NCHW (B, C_feat, H, W)."""
    Bq, Cq, Hq, Wq = feat.shape
    # patch_embed(x).flatten(2).transpose(1, 2)  ->  tokens (B, HW, DIM)
    tokens = feat.transpose(0, 2, 3, 1).reshape(Bq * Hq * Wq, Cq).astype(jnp.bfloat16)
    emb = patch_embed(tokens, params["pe_w"], params["pe_b"])      # (M, DIM) bf16
    emb = emb.reshape(Bq, Hq * Wq, DIM)

    # cls token concat + positional embedding (emb_dropout is identity in eval)
    cls = jnp.broadcast_to(params["cls"], (Bq, 1, DIM))
    x = jnp.concatenate([cls, emb.astype(jnp.float32)], axis=1) + params["pos"]
    x = jnp.pad(x, ((0, 0), (0, N_PAD - N_TOK), (0, 0)))           # (B, N_PAD, DIM)
    x = x.astype(jnp.bfloat16)                                     # halve the HBM->VMEM DMA

    # fused: depth transformer blocks + final LayerNorm(cls) + FC head
    logits_pad = transformer_forward(x, params)                    # (B, 1, N_CLS_PAD)
    return logits_pad[:, 0, :NUM_CLASSES]


# --------------------------------- main --------------------------------------
if __name__ == "__main__":
    key = jax.random.PRNGKey(0)
    k_feat, k_params = jax.random.split(key)

    # synthetic backbone feature map (what self.backbone(x) would produce), NCHW
    feat = jax.random.normal(k_feat, (B, C_FEAT, FH, FW), dtype=jnp.float32)
    params = init_params(k_params)

    logits = vtr_forward(feat, params)
    logits = jax.block_until_ready(logits)
    assert logits.shape == (B, NUM_CLASSES)
    assert bool(jnp.all(jnp.isfinite(logits)))
    print("KERNEL_OK")
</pallas_src>

<mosaic_0001>
module attributes {stable_mosaic.version = 11 : i64} {
  func.func @_patch_embed_kernel(%arg0: i32, %arg1: memref<128x8xbf16, #tpu.memory_space<vmem>>, %arg2: memref<8x32xbf16, #tpu.memory_space<vmem>>, %arg3: memref<1x32xf32, #tpu.memory_space<vmem>>, %arg4: memref<128x32xbf16, #tpu.memory_space<vmem>>) attributes {dimension_semantics = [#tpu.dimension_semantics<parallel>], iteration_bounds = array<i64: 1>, scalar_prefetch = 0 : i64, scratch_operands = 0 : i64, tpu.core_type = #tpu.core_type<tc>, window_params = [{transform_indices = @transform_0, window_bounds = array<i64: 128, 8>}, {pipeline_mode = #tpu.pipeline_mode<synchronous>, transform_indices = @transform_1, window_bounds = array<i64: 8, 32>}, {pipeline_mode = #tpu.pipeline_mode<synchronous>, transform_indices = @transform_2, window_bounds = array<i64: 1, 32>}, {transform_indices = @transform_3, window_bounds = array<i64: 128, 32>}]} {
    %c0 = arith.constant 0 : index
    %c0_0 = arith.constant 0 : index
    %0 = vector.load %arg1[%c0, %c0_0] : memref<128x8xbf16, #tpu.memory_space<vmem>>, vector<128x8xbf16>
    %c0_1 = arith.constant 0 : index
    %c0_2 = arith.constant 0 : index
    %1 = vector.load %arg2[%c0_1, %c0_2] : memref<8x32xbf16, #tpu.memory_space<vmem>>, vector<8x32xbf16>
    %cst = arith.constant dense<0.000000e+00> : vector<128x32xf32>
    %2 = tpu.matmul %0, %1, %cst {dimension_numbers = #tpu.dot_dimension_numbers<[1], [0], [0], [1], [0, 0, 1, 1], [], []>} : vector<128x8xbf16>, vector<8x32xbf16>, vector<128x32xf32> -> vector<128x32xf32>
    %c0_3 = arith.constant 0 : index
    %c0_4 = arith.constant 0 : index
    %3 = vector.load %arg3[%c0_3, %c0_4] : memref<1x32xf32, #tpu.memory_space<vmem>>, vector<1x32xf32>
    %4 = vector.broadcast %3 : vector<1x32xf32> to vector<128x32xf32>
    %5 = arith.addf %2, %4 : vector<128x32xf32>
    %6 = arith.truncf %5 : vector<128x32xf32> to vector<128x32xbf16>
    %c0_5 = arith.constant 0 : index
    %c0_6 = arith.constant 0 : index
    %7 = vector.load %arg4[%c0_5, %c0_6] : memref<128x32xbf16, #tpu.memory_space<vmem>>, vector<128x32xbf16>
    tpu.vector_store %arg4[%c0_5, %c0_6], %6 {strides = array<i32>} : memref<128x32xbf16, #tpu.memory_space<vmem>>, vector<128x32xbf16>,
    return
  }
  func.func @transform_0(%arg0: i32) -> (i32, i32) {
    %c0_i32 = arith.constant 0 : i32
    %c0_i32_0 = arith.constant 0 : i32
    return %arg0, %c0_i32 : i32, i32
  }
  func.func @transform_1(%arg0: i32) -> (i32, i32) {
    %c0_i32 = arith.constant 0 : i32
    %c0_i32_0 = arith.constant 0 : i32
    %c0_i32_1 = arith.constant 0 : i32
    return %c0_i32, %c0_i32_0 : i32, i32
  }
  func.func @transform_2(%arg0: i32) -> (i32, i32) {
    %c0_i32 = arith.constant 0 : i32
    %c0_i32_0 = arith.constant 0 : i32
    %c0_i32_1 = arith.constant 0 : i32
    return %c0_i32, %c0_i32_0 : i32, i32
  }
  func.func @transform_3(%arg0: i32) -> (i32, i32) {
    %c0_i32 = arith.constant 0 : i32
    %c0_i32_0 = arith.constant 0 : i32
    return %arg0, %c0_i32 : i32, i32
  }
}

</mosaic_0001>

<bundles_post_ra>
// kernel: tpu_custom_call.1
= control target key start
LH: loop header
LB: loop body
LE: loop exit
PB: predicated region body
PF: predicated region fallthrough
CT: control target
= control target key end

     0   :  { %vm104_vm0 = vcmask 1043456   ;;  %vm79_vm1 = vcmask 64512   ;;  %vm269_vm2 = vcmask 257024   ;;  %s500_s1 = inlined_call_operand.vmem [shape: bf16[8,32], index: 1, kind: input, shape index: {}]   ;;  %s501_s0 = inlined_call_operand.vmem [shape: bf16[128,8], index: 0, kind: input, shape index: {}]   ;;  %s502_s2 = inlined_call_operand.vmem [shape: f32[1,32], index: 2, kind: input, shape index: {}]   ;;  %s503_s3 = inlined_call_operand.vmem [shape: bf16[128,32], index: 3, kind: output, shape index: {}]  }
   0x1   :  { %v31_v0 = vld [vmem:[%s500_s1] sm:$0xf]  ;;  %v372_v4 = vld [vmem:[%s501_s0 + $0x8] sm:$0xff]   ;;  %v374_v6 = vld [vmem:[%s501_s0 + $0x10] sm:$0xff]  }
   0x2   :  { %368 = vmatprep.subr.msk.bf16.mxu0 %vm104_vm0, %v31_v0  ;;  %369 = vmatprep.subr.msk.bf16.mxu1 %vm104_vm0, %v31_v0  ;;  %v106_v1 = vsel %vm104_vm0, %v31_v0, 0  ;;  %v370_v2 = vld [vmem:[%s501_s0] sm:$0xff]   ;;  %v373_v5 = vld [vmem:[%s501_s0 + $0x28] sm:$0xff]   ;;  %v375_v7 = vld [vmem:[%s501_s0 + $0x30] sm:$0xff]  }
   0x3   :  { %349 = vmatpush3.bf16.msra.mxu0 %v106_v1  ;;  %367 = vmatpush3.bf16.msra.mxu1 %v106_v1  ;;  %v371_v3 = vld [vmem:[%s501_s0 + $0x20] sm:$0xff]   ;;  %v376_v8 = vld [vmem:[%s501_s0 + $0x18] sm:$0xff]  }
   0x4   :  { %350 = vmatprep.mubr.msk.bf16.mxu0 %vm79_vm1, %v370_v2  ;;  %358 = vmatprep.mubr.msk.bf16.mxu1 %vm79_vm1, %v371_v3  ;;  %v377_v9 = vld [vmem:[%s501_s0 + $0x38] sm:$0xff]   ;;  %v290_v10 = vld [vmem:[%s502_s2] ss:$0 sm:$0xff] }
   0x6   :  { %351 = vmatmul.mubr.msk.bf16.vlgmr.msra.gmra.mrb[0].mxu0 %vm79_vm1, %v372_v4  ;;  %359 = vmatmul.mubr.msk.bf16.vlgmr.msra.gmra.mrb[0].mxu1 %vm79_vm1, %v373_v5 }
   0x7   :  { %354 = vmatprep.mubr.msk.bf16.mxu0 %vm79_vm1, %v374_v6  ;;  %362 = vmatprep.mubr.msk.bf16.mxu1 %vm79_vm1, %v375_v7 }
   0xe   :  { %355 = vmatmul.mubr.msk.bf16.gmra.mrb[4].mxu0 %vm79_vm1, %v376_v8  ;;  %363 = vmatmul.mubr.msk.bf16.gmra.mrb[4].mxu1 %vm79_vm1, %v377_v9 }
  0xd9   :  { %v352_v11 = vpop.f32.mrb[0].mxu0  ;;  %v360_v13 = vpop.f32.mrb[0].mxu1 }
  0xda   :  { %v151_v12 = vadd.f32 %v352_v11, %v290_v10  ;;  %v142_v14 = vpop.f32.mrb[1].mxu0  ;;  %v183_v15 = vadd.f32 %v360_v13, %v290_v10  ;;  %v174_v17 = vpop.f32.mrb[1].mxu1 }
  0xdb   :  { %v143_v16 = vadd.f32 %v290_v10, %v142_v14  ;;  %v353_v18 = vpop.f32.mrb[2].mxu0  ;;  %v175_v20 = vadd.f32 %v290_v10, %v174_v17  ;;  %v361_v22 = vpop.f32.mrb[2].mxu1 }
  0xdc   :  { %v325_v19 = vpack.c.bf16 %v151_v12, %v151_v12  ;;  %v154_v21 = vadd.f32 %v353_v18, %v290_v10  ;;  %v145_v23 = vpop.f32.mrb[3].mxu0  ;;  %v333_v24 = vpack.c.bf16 %v183_v15, %v183_v15  ;;  %v186_v26 = vadd.f32 %v361_v22, %v290_v10  ;;  %v177_v28 = vpop.f32.mrb[3].mxu1 }
  0xdd   :  { %v323_v25 = vpack.c.bf16 %v143_v16, %v143_v16  ;;  %v146_v27 = vadd.f32 %v290_v10, %v145_v23  ;;  %v331_v29 = vpack.c.bf16 %v175_v20, %v175_v20  ;;  %v178_v31 = vadd.f32 %v290_v10, %v177_v28 }
  0xde   :  { %272 = vst.msk [vmem:[%s503_s3 + $0x8] sm:$0xf] %vm269_vm2, %v325_v19  ;;  %v326_v30 = vpack.c.bf16 %v154_v21, %v154_v21  ;;  %280 = vst.msk [vmem:[%s503_s3 + $0x28] sm:$0xf] %vm269_vm2, %v333_v24  ;;  %v334_v32 = vpack.c.bf16 %v186_v26, %v186_v26 }
  0xdf   :  { %270 = vst.msk [vmem:[%s503_s3] sm:$0xf] %vm269_vm2, %v323_v25  ;;  %v324_v33 = vpack.c.bf16 %v146_v27, %v146_v27  ;;  %278 = vst.msk [vmem:[%s503_s3 + $0x20] sm:$0xf] %vm269_vm2, %v331_v29  ;;  %v332_v34 = vpack.c.bf16 %v178_v31, %v178_v31 }
  0xe0   :  { %273 = vst.msk [vmem:[%s503_s3 + $0xc] sm:$0xf] %vm269_vm2, %v326_v30  ;;  %281 = vst.msk [vmem:[%s503_s3 + $0x2c] sm:$0xf] %vm269_vm2, %v334_v32 }
  0xe1   :  { %271 = vst.msk [vmem:[%s503_s3 + $0x4] sm:$0xf] %vm269_vm2, %v324_v33  ;;  %v356_v35 = vpop.f32.mrb[4].mxu0  ;;  %279 = vst.msk [vmem:[%s503_s3 + $0x24] sm:$0xf] %vm269_vm2, %v332_v34  ;;  %v364_v37 = vpop.f32.mrb[4].mxu1 }
  0xe2   :  { %v167_v36 = vadd.f32 %v356_v35, %v290_v10  ;;  %v158_v38 = vpop.f32.mrb[5].mxu0  ;;  %v199_v39 = vadd.f32 %v364_v37, %v290_v10  ;;  %v190_v41 = vpop.f32.mrb[5].mxu1 }
  0xe3   :  { %v159_v40 = vadd.f32 %v290_v10, %v158_v38  ;;  %v357_v42 = vpop.f32.mrb[6].mxu0  ;;  %v191_v44 = vadd.f32 %v290_v10, %v190_v41  ;;  %v365_v46 = vpop.f32.mrb[6].mxu1 }
  0xe4   :  { %v329_v43 = vpack.c.bf16 %v167_v36, %v167_v36  ;;  %v170_v45 = vadd.f32 %v357_v42, %v290_v10  ;;  %v161_v47 = vpop.f32.mrb[7].mxu0  ;;  %v337_v48 = vpack.c.bf16 %v199_v39, %v199_v39  ;;  %v202_v50 = vadd.f32 %v365_v46, %v290_v10  ;;  %v193_v52 = vpop.f32.mrb[7].mxu1 }
  0xe5   :  { %v327_v49 = vpack.c.bf16 %v159_v40, %v159_v40  ;;  %v162_v51 = vadd.f32 %v290_v10, %v161_v47  ;;  %v335_v53 = vpack.c.bf16 %v191_v44, %v191_v44  ;;  %v194_v55 = vadd.f32 %v290_v10, %v193_v52 }
  0xe6   :  { %276 = vst.msk [vmem:[%s503_s3 + $0x18] sm:$0xf] %vm269_vm2, %v329_v43  ;;  %v330_v54 = vpack.c.bf16 %v170_v45, %v170_v45  ;;  %284 = vst.msk [vmem:[%s503_s3 + $0x38] sm:$0xf] %vm269_vm2, %v337_v48  ;;  %v338_v56 = vpack.c.bf16 %v202_v50, %v202_v50 }
  0xe7   :  { %274 = vst.msk [vmem:[%s503_s3 + $0x10] sm:$0xf] %vm269_vm2, %v327_v49  ;;  %v328_v57 = vpack.c.bf16 %v162_v51, %v162_v51  ;;  %282 = vst.msk [vmem:[%s503_s3 + $0x30] sm:$0xf] %vm269_vm2, %v335_v53  ;;  %v336_v58 = vpack.c.bf16 %v194_v55, %v194_v55 }
  0xe8   :  { %277 = vst.msk [vmem:[%s503_s3 + $0x1c] sm:$0xf] %vm269_vm2, %v330_v54  ;;  %285 = vst.msk [vmem:[%s503_s3 + $0x3c] sm:$0xf] %vm269_vm2, %v338_v56 }
  0xe9   :  { %275 = vst.msk [vmem:[%s503_s3 + $0x14] sm:$0xf] %vm269_vm2, %v328_v57  ;;  %283 = vst.msk [vmem:[%s503_s3 + $0x34] sm:$0xf] %vm269_vm2, %v336_v58 }

</bundles_post_ra>
